<compile_context>
chip_gen: v5e
topology: v5e:2x2
jax: 0.10.0
libtpu: 0.0.40
codegen_flags: <defaults>
</compile_context>

<pallas_src>
import functools
import math

import jax
import jax.numpy as jnp
from jax.experimental import pallas as pl
from jax.experimental.pallas import tpu as pltpu


# ---------------------------------------------------------------------------
# Buffer setup (mirrors PositionalEncoding.__init__), but squeezed to 2-D (max_len, E)
# ---------------------------------------------------------------------------
def make_positional_encoding(max_len: int, embed_size: int) -> jnp.ndarray:
    position = jnp.arange(max_len, dtype=jnp.float32)[:, None]            # (max_len, 1)
    div_term = jnp.exp(
        jnp.arange(0, embed_size, 2, dtype=jnp.float32)
        * (-math.log(10000.0) / embed_size)
    )                                                                      # (E//2,)
    pe = jnp.zeros((max_len, embed_size), dtype=jnp.float32)
    pe = pe.at[:, 0::2].set(jnp.sin(position * div_term))
    pe = pe.at[:, 1::2].set(jnp.cos(position * div_term))
    return pe                                                              # (max_len, E)


# ---------------------------------------------------------------------------
# Kernels
# ---------------------------------------------------------------------------
def _pe_add_kernel(x_ref, pe_ref, o_ref):
    # x_ref: (tile_S, B, E)   pe_ref: (tile_S, E)  -> broadcast over the batch axis.
    o_ref[...] = (x_ref[...] + pe_ref[...][:, None, :]).astype(o_ref.dtype)


def _pe_add_dropout_kernel(x_ref, pe_ref, keep_ref, o_ref, *, inv_keep: float):
    # Inverted dropout: keep_ref holds 0/1; kept values are scaled by 1/(1-p).
    y = x_ref[...] + pe_ref[...][:, None, :]
    o_ref[...] = (y * keep_ref[...] * inv_keep).astype(o_ref.dtype)


# ---------------------------------------------------------------------------
# Wrapper
# ---------------------------------------------------------------------------
def _choose_tile_s(S, B, E, itemsize, max_block_bytes=4 * 1024 * 1024):
    """Largest multiple-of-8 row tile whose (tile_S, B, E) block fits the budget.

    Budget is sized against v7x's 64 MiB physical VMEM: with train-mode mask,
    (x + mask + out) blocks double-buffered ~= 6 * block_bytes <= ~24 MiB.
    """
    rows = max_block_bytes // max(1, B * E * itemsize)
    rows = max(8, (rows // 8) * 8)
    return min(rows, S)


def positional_encoding_forward(x, pe, *, p: float = 0.1, training: bool = False,
                                rng_key=None, tile_s: int | None = None):
    """x: (S, B, E); pe: (max_len, E) from make_positional_encoding."""
    S, B, E = x.shape
    max_len = pe.shape[0]
    assert pe.shape[1] == E and max_len >= S, "pe buffer too short / wrong embed size"
    assert S % 8 == 0, "pad the sequence length to a multiple of 8 (sublane tiling)"

    if tile_s is None:
        tile_s = _choose_tile_s(S, B, E, jnp.dtype(x.dtype).itemsize)
    tile_s = min(tile_s, S)
    assert tile_s % 8 == 0, "tile_s must be a multiple of 8"
    # Last (possibly ragged) tile must still read pe rows that exist.
    assert max_len >= -(-S // tile_s) * tile_s, "pe max_len too small for the tiling"

    grid = (pl.cdiv(S, tile_s),)

    x_spec = pl.BlockSpec((tile_s, B, E), lambda i: (i, 0, 0))
    pe_spec = pl.BlockSpec((tile_s, E), lambda i: (i, 0))
    mask_spec = pl.BlockSpec((tile_s, B, E), lambda i: (i, 0, 0))
    out_spec = pl.BlockSpec((tile_s, B, E), lambda i: (i, 0, 0))

    compiler_params = pltpu.CompilerParams(dimension_semantics=("parallel",))
    out_shape = jax.ShapeDtypeStruct((S, B, E), x.dtype)

    if training and p > 0.0:
        if p >= 1.0:
            return jnp.zeros_like(x)
        if rng_key is None:
            rng_key = jax.random.PRNGKey(0)
        keep = jax.random.bernoulli(rng_key, 1.0 - p, (S, B, E)).astype(x.dtype)
        kernel = functools.partial(_pe_add_dropout_kernel, inv_keep=1.0 / (1.0 - p))
        return pl.pallas_call(
            kernel,
            out_shape=out_shape,
            grid_spec=pltpu.PrefetchScalarGridSpec(
                num_scalar_prefetch=0,
                grid=grid,
                in_specs=[x_spec, pe_spec, mask_spec],
                out_specs=out_spec,
            ),
            compiler_params=compiler_params,
        )(x, pe, keep)

    return pl.pallas_call(
        _pe_add_kernel,
        out_shape=out_shape,
        grid_spec=pltpu.PrefetchScalarGridSpec(
            num_scalar_prefetch=0,
            grid=grid,
            in_specs=[x_spec, pe_spec],
            out_specs=out_spec,
        ),
        compiler_params=compiler_params,
    )(x, pe)


# ---------------------------------------------------------------------------
# Demo / correctness check
# ---------------------------------------------------------------------------
if __name__ == "__main__":
    SEQ, BATCH, EMBED = 64, 4, 512      # module uses embed_size=512; lane-dense E
    MAX_LEN = 128
    P_DROPOUT = 0.1
    TILE_S = 16                          # force a multi-step, pipelined grid at demo scale

    key = jax.random.PRNGKey(0)
    kx, kd = jax.random.split(key)
    x = jax.random.normal(kx, (SEQ, BATCH, EMBED), dtype=jnp.float32)
    pe = make_positional_encoding(MAX_LEN, EMBED)

    # Eval mode (dropout = identity): exact check vs reference math.
    out_eval = positional_encoding_forward(x, pe, p=P_DROPOUT, training=False,
                                           tile_s=TILE_S)
    out_eval = jax.block_until_ready(out_eval)
    ref_eval = x + pe[:SEQ][:, None, :]
    assert out_eval.shape == (SEQ, BATCH, EMBED)
    assert jnp.allclose(out_eval, ref_eval, atol=1e-6, rtol=1e-6), "eval-mode mismatch"

    # Train mode (inverted dropout): check against a reference built with the same mask.
    out_train = positional_encoding_forward(x, pe, p=P_DROPOUT, training=True,
                                            rng_key=kd, tile_s=TILE_S)
    out_train = jax.block_until_ready(out_train)
    keep_ref = jax.random.bernoulli(kd, 1.0 - P_DROPOUT,
                                    (SEQ, BATCH, EMBED)).astype(jnp.float32)
    ref_train = (x + pe[:SEQ][:, None, :]) * keep_ref * (1.0 / (1.0 - P_DROPOUT))
    assert out_train.shape == (SEQ, BATCH, EMBED)
    assert jnp.allclose(out_train, ref_train, atol=1e-5, rtol=1e-5), "train-mode mismatch"

    print("KERNEL_OK")
</pallas_src>

<mosaic_0001>
module attributes {stable_mosaic.version = 11 : i64} {
  func.func @_pe_add_kernel(%arg0: i32, %arg1: memref<16x4x512xf32, #tpu.memory_space<vmem>>, %arg2: memref<16x512xf32, #tpu.memory_space<vmem>>, %arg3: memref<16x4x512xf32, #tpu.memory_space<vmem>>) attributes {dimension_semantics = [#tpu.dimension_semantics<parallel>], iteration_bounds = array<i64: 4>, scalar_prefetch = 0 : i64, scratch_operands = 0 : i64, tpu.core_type = #tpu.core_type<tc>, window_params = [{transform_indices = @transform_0, window_bounds = array<i64: 16, 4, 512>}, {transform_indices = @transform_1, window_bounds = array<i64: 16, 512>}, {transform_indices = @transform_2, window_bounds = array<i64: 16, 4, 512>}]} {
    %c0 = arith.constant 0 : index
    %c0_0 = arith.constant 0 : index
    %c0_1 = arith.constant 0 : index
    %0 = vector.load %arg1[%c0, %c0_0, %c0_1] : memref<16x4x512xf32, #tpu.memory_space<vmem>>, vector<16x4x512xf32>
    %c0_2 = arith.constant 0 : index
    %c0_3 = arith.constant 0 : index
    %1 = vector.load %arg2[%c0_2, %c0_3] : memref<16x512xf32, #tpu.memory_space<vmem>>, vector<16x512xf32>
    %2 = vector.shape_cast %1 : vector<16x512xf32> to vector<16x1x512xf32>
    %3 = vector.broadcast %2 : vector<16x1x512xf32> to vector<16x4x512xf32>
    %4 = arith.addf %0, %3 : vector<16x4x512xf32>
    %c0_4 = arith.constant 0 : index
    %c0_5 = arith.constant 0 : index
    %c0_6 = arith.constant 0 : index
    %5 = vector.load %arg3[%c0_4, %c0_5, %c0_6] : memref<16x4x512xf32, #tpu.memory_space<vmem>>, vector<16x4x512xf32>
    tpu.vector_store %arg3[%c0_4, %c0_5, %c0_6], %4 {strides = array<i32>} : memref<16x4x512xf32, #tpu.memory_space<vmem>>, vector<16x4x512xf32>,
    return
  }
  func.func @transform_0(%arg0: i32) -> (i32, i32, i32) {
    %c0_i32 = arith.constant 0 : i32
    %c0_i32_0 = arith.constant 0 : i32
    %c0_i32_1 = arith.constant 0 : i32
    return %arg0, %c0_i32, %c0_i32_0 : i32, i32, i32
  }
  func.func @transform_1(%arg0: i32) -> (i32, i32) {
    %c0_i32 = arith.constant 0 : i32
    %c0_i32_0 = arith.constant 0 : i32
    return %arg0, %c0_i32 : i32, i32
  }
  func.func @transform_2(%arg0: i32) -> (i32, i32, i32) {
    %c0_i32 = arith.constant 0 : i32
    %c0_i32_0 = arith.constant 0 : i32
    %c0_i32_1 = arith.constant 0 : i32
    return %arg0, %c0_i32, %c0_i32_0 : i32, i32, i32
  }
}

</mosaic_0001>

<bundles_post_ra>
// kernel: tpu_custom_call.1
= control target key start
LH: loop header
LB: loop body
LE: loop exit
PB: predicated region body
PF: predicated region fallthrough
CT: control target
= control target key end

     0   :  { %7 = vsyncpa [#allocation3], 0  ;;  %s1331_s0 = inlined_call_operand.hbm [shape: f32[64,4,512], index: 0, kind: input, shape index: {}]   ;;  %s1332_s1 = inlined_call_operand.hbm [shape: f32[128,512], index: 1, kind: input, shape index: {}]   ;;  %s1333_s2 = inlined_call_operand.hbm [shape: f32[64,4,512], index: 2, kind: output, shape index: {}]  }
   0x1   :  { %9 = vsyncpa [#allocation3 + $0x1], 0 }
   0x2   :  { %10 = vsyncpa [#allocation6], 0 }
   0x3   :  { %12 = vsyncpa [#allocation6 + $0x1], 0 }
   0x4   :  { %13 = vsyncpa [#allocation4], 0 }
   0x5   :  { %15 = vsyncpa [#allocation4 + $0x1], 0  ;;  %s918_s9 = smov 0   ;;  %s920_s10 = smov 0  }
   0x6   :  { %s922_s11 = smov 0   ;;  %s924_s12 = smov 0  }
   0x7 LB: > { %s939_s13 = sadd.s32 4294967295, %s895_s12   ;;  %s681_s14 = sadd.s32 4294967294, %s895_s12   ;;  %s895_s12 = sphi %s924_s12, %s1345_s12   ;;  %s891_s11 = sphi %s922_s11, %s1344_s11   ;;  %s887_s10 = sphi %s920_s10, %s1343_s10   ;;  %s883_s9 = sphi %s918_s9, %s1342_s9  }
   0x8   : > { %s943_s15 = sadd.s32 1, %s895_s12   ;;  %s28_s16 = sadd.s32 1, %s891_s11 }
   0x9   : > { %s25_s17 = ssub.s32 %s895_s12, %s943_s15  ;;  %p35_p0 = scmp.ne.s32.totalorder %s891_s11, %s887_s10 }
   0xa   : > { %p26_p1 = scmp.eq.s32.totalorder %s25_s17, 0  ;;  %p36_p2 = scmp.eq.s32.totalorder %s895_s12, 0 }
   0xb   : > { %p41_p3 = scmp.ne.s32.totalorder %s887_s10, %s883_s9  ;;  %p42_p4 = scmp.eq.s32.totalorder %s939_s13, 0 }
   0xc   : > { %s955_s18 = scalar_select %p26_p1, %s891_s11, %s28_s16  }
   0xd   : > { %p957_p5 = por %p36_p2, %p35_p0  ;;  %p961_p6 = por %p42_p4, %p41_p3 }
   0xe   : > { %p91_p7 = scmp.eq.s32.totalorder %s939_s13, 3  ;;  %p97_p8 = scmp.eq.s32.totalorder %s681_s14, 3 }
   0xf   : > { %p725_p9 = scmp.lt.s32.totalorder %s895_s12, 4  ;;  %s976_s23 = sand.u32 1, %s891_s11  }
  0x10   : > { %p967_p10 = por %p91_p7, %p35_p0  ;;  %p971_p11 = por %p97_p8, %p41_p3 }
  0x11   : > { %s703_s24 = sshll.u32 %s895_s12, 8  ;;  %s684_s25 = sshll.u32 %s976_s23, 8 }
  0x12   : > { %s127_s28 = scalar_lea.hbm %s1331_s0, %s703_s24  ;;  %s121_s30 = scalar_lea.vmem [#allocation2], %s684_s25 }
  0x13   : > { %s128_s29 = sshll.u32 %s127_s28, 4  ;;  %s130_s3 = sshll.u32 %s121_s30, 4  ;;  %s129_s29 = int_to_ptr.hbm [resolvable:$true] %s128_s29  ;;  %s131_s3 = int_to_ptr.vmem [resolvable:$true] %s130_s3 }
  0x14   : > { %p985_p12 = pnand %p725_p9, %p957_p5  ;;  %p692_p13 = scmp.ge.s32.totalorder %s895_s12, 1 }
  0x15   : > { %p161_p0 = scmp.lt.s32.totalorder %s895_s12, 5  ;;  %s118_s5 = scalar_lea.sflag [#allocation3], %s976_s23 }
  0x16   : > { %s765_s6 = sshra.s32 %s129_s29, 4  ;;  %p769_p2 = pneg %p985_p12  ;;  %s766_s6 = int_to_ptr.hbm [resolvable:$true] %s765_s6 }
  0x17   : > { %s767_s7 = scalar_lea.hbm %s766_s6, 256  ;;  %s772_s16 = scalar_lea.hbm %s1331_s0, 1024 }
  0x18   : > { %p768_p1 = scmp.ne.s32.totalorder %s766_s6, %s767_s7  ;;  %p773_p5 = scmp.lt.s32.totalorder %s766_s6, %s1331_s0 }
  0x19   : > { %p774_p7 = scmp.lt.s32.totalorder %s772_s16, %s767_s7 }
  0x1a   : > { %p770_p3 = pnand %p769_p2, %p768_p1 }
  0x1b   : > { %p775_p8 = por %p774_p7, %p773_p5 }
  0x1c   : > { %p771_p4 = pneg %p770_p3 }
  0x1e   : > { %p776_p9 = pnand %p775_p8, %p771_p4 }
  0x20   : > { %779 = shalt.err (!%p776_p9)
}
  0x21   : > { %s897_s24 = smov 256   ;;  %s898_s25 = smov 16  }
  0x22   : > { %717 = dma.hbm_to_vmem [thread:$0]  (!%p985_p12), %s129_s29, 4096, %s131_s3, %s118_s5, %s897_s24, %s897_s24, %s898_s25  }
  0x23   : > { %p1009_p1 = pnand %p692_p13, %p161_p0  ;;  %s688_s27 = sshll.u32 %s976_s23, 6 }
  0x24   : > { %s705_s28 = sshll.u32 %s895_s12, 6  ;;  %s144_s14 = scalar_lea.vmem [#allocation5], %s688_s27 }
  0x25   : > { %s150_s7 = scalar_lea.hbm %s1332_s1, %s705_s28  ;;  %s153_s16 = sshll.u32 %s144_s14, 4  ;;  %s154_s16 = int_to_ptr.vmem [resolvable:$true] %s153_s16 }
  0x26   : > { %s151_s8 = sshll.u32 %s150_s7, 4  ;;  %s141_s17 = scalar_lea.sflag [#allocation6], %s976_s23  ;;  %s152_s8 = int_to_ptr.hbm [resolvable:$true] %s151_s8 }
  0x27   : > { %s795_s19 = sshra.s32 %s152_s8, 4  ;;  %s802_s24 = scalar_lea.hbm %s1332_s1, 512  ;;  %s796_s19 = int_to_ptr.hbm [resolvable:$true] %s795_s19 }
  0x28   : > { %s797_s29 = scalar_lea.hbm %s796_s19, 64  ;;  %p803_p4 = scmp.lt.s32.totalorder %s796_s19, %s1332_s1 }
  0x29   : > { %p798_p3 = scmp.ne.s32.totalorder %s796_s19, %s797_s29  ;;  %p804_p5 = scmp.lt.s32.totalorder %s802_s24, %s797_s29 }
  0x2b   : > { %p800_p13 = pnand %p798_p3, %p769_p2  ;;  %p805_p7 = por %p804_p5, %p803_p4 }
  0x2d   : > { %p801_p0 = pneg %p800_p13 }
  0x2f   : > { %p806_p8 = pnand %p805_p7, %p801_p0 }
  0x31   : > { %809 = shalt.err (!%p806_p8)
}
  0x32   : > { %s899_s23 = smov 512   ;;  %s900_s27 = smov 32  }
  0x33   : > { %720 = dma.hbm_to_vmem [thread:$0]  (!%p985_p12), %s152_s8, 1024, %s154_s16, %s141_s17, %s899_s23, %s899_s23, %s900_s27  }
  0x34   : > { %165 = sbr.rel (%p1009_p1) target bundleno = 131 (0x83), region = 28  ;;  %s1033_s30 = sand.u32 (!%p1009_p1), 1, %s887_s10  }
  0x35   : > { %s693_s6 = sshll.u32 (!%p1009_p1), %s1033_s30, 8  ;;  %s168_s7 = scalar_lea.sflag (!%p1009_p1), [#allocation3], %s1033_s30 }
  0x36   : > { %s1039_s14 = scalar_lea.vmem (!%p1009_p1), [#allocation2], %s693_s6 }
  0x39   : > { %870 = dma.done.wait (%p961_p6), %s168_s7, 4096  }
  0x3a   : > { %872 = vsyncadd (%p961_p6), %s168_s7, 4294963200  ;;  %s694_s4 = sshll.u32 %s1033_s30, 6  ;;  %s178_s26 = scalar_lea.sflag [#allocation6], %s1033_s30 }
  0x3b   : > { %s1047_s8 = scalar_lea.vmem [#allocation5], %s694_s4 }
  0x3c   : > { %874 = dma.done.wait (%p961_p6), %s178_s26, 1024  }
  0x3d   : > { %876 = vsyncadd (%p961_p6), %s178_s26, 4294966272  ;;  %vm265_vm0 = vcmask 1040384   ;;  %vm267_vm1 = vcmask 1042434   ;;  %vm269_vm2 = vcmask 1041408   ;;  %v1054_v0 = vld [vmem:[%s1047_s8] sm:$0xff]  ;;  %v244_v1 = vld [vmem:[%s1047_s8 + $0x8] sm:$0xff] }
  0x3e   : > { %vm439_vm3 = vcmask 1043456   ;;  %vm271_vm4 = vcmask 1041409   ;;  %vm273_vm5 = vcmask 1043459   ;;  %vm275_vm6 = vcmask 1042433   ;;  %v245_v2 = vld [vmem:[%s1047_s8 + $0x10] sm:$0xff]  ;;  %v246_v3 = vld [vmem:[%s1047_s8 + $0x18] sm:$0xff] }
  0x3f   : > { %v1059_v4 = vrot.slane %v244_v1, 7  ;;  %vm279_vm7 = vcmask 1044484   ;;  %vm281_vm8 = vcmask 1043458   ;;  %vm285_vm9 = vcmask 1045509   ;;  %v211_v27 = vld [vmem:[%s1039_s14] sm:$0xff]  ;;  %v212_v29 = vld [vmem:[%s1039_s14 + $0x8] sm:$0xff] }
  0x40   : > { %v1061_v5 = vrot.slane %v245_v2, 6  ;;  %v1063_v6 = vrot.slane %v246_v3, 5  ;;  %vm1334_vm10 = vcmask 1044483   ;;  %vm291_vm11 = vcmask 1046534   ;;  %v213_v43 = vld [vmem:[%s1039_s14 + $0x10] sm:$0xff]  ;;  %v214_v45 = vld [vmem:[%s1039_s14 + $0x18] sm:$0xff] }
  0x41   : > { %v266_v7 = vsel %vm265_vm0, %v1054_v0, %v1059_v4  ;;  %v272_v8 = vsel %vm271_vm4, %v1054_v0, %v1059_v4  ;;  %v278_v9 = vsel %vm267_vm1, %v1054_v0, %v1059_v4  ;;  %v284_v10 = vsel %vm273_vm5, %v1054_v0, %v1059_v4  ;;  %v215_v47 = vld [vmem:[%s1039_s14 + $0x20] sm:$0xff]  ;;  %s1114_s20 = scalar_lea.vmem [#allocation7], %s693_s6  ;;  %v216_v59 = vld [vmem:[%s1039_s14 + $0x28] sm:$0xff]  ;;  %v217_v62 = vld [vmem:[%s1039_s14 + $0x30] sm:$0xff]  ;;  %s707_s16 = sshll.u32 %s939_s13, 8 }
  0x42   : > { %v268_v11 = vsel %vm267_vm1, %v1061_v5, %v1063_v6  ;;  %v274_v12 = vsel %vm273_vm5, %v1061_v5, %v1063_v6  ;;  %v280_v13 = vsel %vm279_vm7, %v1061_v5, %v1063_v6  ;;  %v286_v14 = vsel %vm285_vm9, %v1061_v5, %v1063_v6  ;;  %s1283_s19 = scalar_lea.hbm %s1333_s2, %s707_s16  ;;  %s582_s29 = sshll.u32 %s1114_s20, 4  ;;  %s583_s29 = int_to_ptr.vmem [resolvable:$true] %s582_s29 }
  0x43   : > { %vm293_vm12 = vcmask 1045508   ;;  %v270_v15 = vsel %vm269_vm2, %v266_v7, %v268_v11  ;;  %v276_v16 = vsel %vm275_vm6, %v272_v8, %v274_v12  ;;  %v282_v17 = vsel %vm281_vm8, %v278_v9, %v280_v13  ;;  %v218_v12 = vld [vmem:[%s1039_s14 + $0x38] sm:$0xff]  ;;  %s584_s3 = sshll.u32 %s1283_s19, 4  ;;  %s569_s5 = scalar_lea.sflag [#allocation4], %s1033_s30  ;;  %s585_s3 = int_to_ptr.hbm [resolvable:$true] %s584_s3 }
  0x44   : > { %v288_v18 = vsel %vm1334_vm10, %v284_v10, %v286_v14  ;;  %vm297_vm13 = vcmask 1046528   ;;  %v343_v19 = vperm.slane %v270_v15, 0  ;;  %v344_v20 = vperm.slane %v270_v15, 1  ;;  %s839_s24 = sshra.s32 %s585_s3, 4  ;;  %s845_s27 = scalar_lea.hbm %s1333_s2, 1024  ;;  %s840_s24 = int_to_ptr.hbm [resolvable:$true] %s839_s24 }
  0x45   : > { %v345_v21 = vperm.slane %v270_v15, 2  ;;  %v346_v22 = vperm.slane %v270_v15, 3  ;;  %vm299_vm14 = vcmask 1046533   ;;  %v277_v23 = vrot.slane %v276_v16, 1  ;;  %s841_s25 = scalar_lea.hbm %s840_s24, 256  ;;  %p846_p9 = scmp.lt.s32.totalorder %s840_s24, %s1333_s2 }
  0x46   : > { %v283_v24 = vrot.slane %v282_v17, 2  ;;  %v1093_v25 = vrot.slane %v288_v18, 3  ;;  %v290_v26 = vsel %vm279_vm7, %v1054_v0, %v1059_v4  ;;  %v407_v28 = vrot.slane %v344_v20, 4  ;;  %p842_p6 = scmp.ne.s32.totalorder %s840_s24, %s841_s25  ;;  %p847_p1 = scmp.lt.s32.totalorder %s845_s27, %s841_s25 }
  0x47   : > { %v408_v30 = vrot.slane %v346_v22, 4  ;;  %v292_v31 = vsel %vm291_vm11, %v1061_v5, %v1063_v6  ;;  %v296_v32 = vsel %vm285_vm9, %v1054_v0, %v1059_v4  ;;  %v347_v33 = vperm.slane %v277_v23, 0 }
  0x48   : > { %v348_v34 = vperm.slane %v277_v23, 1  ;;  %v349_v35 = vperm.slane %v277_v23, 2  ;;  %v350_v36 = vperm.slane %v277_v23, 3  ;;  %vm304_vm15 = vcmask 1045504   ;;  %p843_p12 = pnand %p842_p6, %p967_p10  ;;  %p848_p3 = por %p847_p1, %p846_p9 }
  0x49   : > { %v440_v37 = vsel %vm439_vm3, %v343_v19, %v407_v28  ;;  %v441_v38 = vsel %vm439_vm3, %v345_v21, %v408_v30  ;;  %v351_v39 = vperm.slane %v283_v24, 0  ;;  %v352_v40 = vperm.slane %v283_v24, 1  ;;  %v220_v28 = vld [vmem:[%s1039_s14 + $0x48] sm:$0xff] }
  0x4a   : > { %v504_v41 = vadd.f32 %v440_v37, %v211_v27  ;;  %v505_v42 = vadd.f32 %v441_v38, %v212_v29  ;;  %v409_v44 = vrot.slane %v348_v34, 4  ;;  %v410_v46 = vrot.slane %v350_v36, 4  ;;  %p844_p2 = pneg %p843_p12 }
  0x4b   : > { %v411_v48 = vrot.slane %v352_v40, 4  ;;  %v353_v49 = vperm.slane %v283_v24, 2  ;;  %v354_v50 = vperm.slane %v283_v24, 3  ;;  %v355_v51 = vperm.slane %v1093_v25, 0  ;;  %v219_v24 = vld [vmem:[%s1039_s14 + $0x40] sm:$0xff]  ;;  %v248_v40 = vld [vmem:[%s1047_s8 + $0x28] sm:$0xff] }
  0x4c   : > { %vm309_vm10 = vcmask 1046529   ;;  %536 = vst [vmem:[%s1114_s20] sm:$0xff] %v504_v41  ;;  %v442_v52 = vsel %vm439_vm3, %v347_v33, %v409_v44  ;;  %v443_v53 = vsel %vm439_vm3, %v349_v35, %v410_v46  ;;  %v356_v54 = vperm.slane %v1093_v25, 1  ;;  %p849_p13 = pnand %p848_p3, %p844_p2 }
  0x4d   : > { %v357_v55 = vperm.slane %v1093_v25, 2  ;;  %537 = vst [vmem:[%s1114_s20 + $0x8] sm:$0xff] %v505_v42  ;;  %v506_v56 = vadd.f32 %v442_v52, %v213_v43  ;;  %v507_v57 = vadd.f32 %v443_v53, %v214_v45  ;;  %v444_v58 = vsel %vm439_vm3, %v351_v39, %v411_v48  ;;  %v222_v42 = vld [vmem:[%s1039_s14 + $0x58] sm:$0xff]  ;;  %v249_v48 = vld [vmem:[%s1047_s8 + $0x30] sm:$0xff] }
  0x4e   : > { %v412_v60 = vrot.slane %v354_v50, 4  ;;  %v508_v61 = vadd.f32 %v444_v58, %v215_v47  ;;  %v413_v63 = vrot.slane %v356_v54, 4  ;;  %v358_v1 = vperm.slane %v1093_v25, 3  ;;  %v250_v53 = vld [vmem:[%s1047_s8 + $0x38] sm:$0xff] }
  0x4f   : > { %v294_v2 = vsel %vm293_vm12, %v290_v26, %v292_v31  ;;  %538 = vst [vmem:[%s1114_s20 + $0x10] sm:$0xff] %v506_v56  ;;  %v298_v8 = vsel %vm297_vm13, %v1063_v6, %v1061_v5  ;;  %v302_v9 = vsel %vm291_vm11, %v1054_v0, %v1059_v4  ;;  %v303_v22 = vsel %vm265_vm0, %v1061_v5, %v1063_v6  ;;  %v224_v56 = vld [vmem:[%s1039_s14 + $0x68] sm:$0xff] }
  0x50   : > { %v445_v3 = vsel %vm439_vm3, %v353_v49, %v412_v60  ;;  %v295_v7 = vrot.slane %v294_v2, 4  ;;  %539 = vst [vmem:[%s1114_s20 + $0x18] sm:$0xff] %v507_v57  ;;  %v446_v11 = vsel %vm439_vm3, %v355_v51, %v413_v63  ;;  %v414_v13 = vrot.slane %v358_v1, 4  ;;  %v223_v51 = vld [vmem:[%s1039_s14 + $0x60] sm:$0xff] }
  0x51   : > { %v509_v10 = vadd.f32 %v445_v3, %v216_v59  ;;  %v300_v14 = vsel %vm299_vm14, %v296_v32, %v298_v8  ;;  %540 = vst [vmem:[%s1114_s20 + $0x20] sm:$0xff] %v508_v61  ;;  %v510_v15 = vadd.f32 %v446_v11, %v217_v62  ;;  %v305_v26 = vsel %vm304_vm15, %v303_v22, %v302_v9  ;;  %v1173_v60 = vld [vmem:[%s1047_s8 + $0x20] sm:$0xff]  ;;  %v226_v11 = vld [vmem:[%s1039_s14 + $0x78] sm:$0xff] }
  0x52   : > { %v359_v16 = vperm.slane %v295_v7, 0  ;;  %v360_v17 = vperm.slane %v295_v7, 1  ;;  %v361_v18 = vperm.slane %v295_v7, 2  ;;  %v447_v19 = vsel %vm439_vm3, %v357_v55, %v414_v13 }
  0x53   : > { %541 = vst [vmem:[%s1114_s20 + $0x28] sm:$0xff] %v509_v10  ;;  %v362_v20 = vperm.slane %v295_v7, 3  ;;  %v301_v21 = vrot.slane %v300_v14, 5  ;;  %v511_v23 = vadd.f32 %v447_v19, %v218_v12  ;;  %v307_v27 = vsel %vm297_vm13, %v1059_v4, %v1054_v0  ;;  %v221_v4 = vld [vmem:[%s1039_s14 + $0x50] sm:$0xff] }
  0x54   : > { %542 = vst [vmem:[%s1114_s20 + $0x30] sm:$0xff] %v510_v15  ;;  %v415_v25 = vrot.slane %v360_v17, 4  ;;  %v306_v35 = vrot.slane %v305_v26, 6  ;;  %v308_v36 = vsel %vm271_vm4, %v1061_v5, %v1063_v6  ;;  %v1169_v54 = vrot.slane %v248_v40, 7  ;;  %v225_v7 = vld [vmem:[%s1039_s14 + $0x70] sm:$0xff] }
  0x55   : > { %v416_v29 = vrot.slane %v362_v20, 4  ;;  %v363_v30 = vperm.slane %v301_v21, 0  ;;  %v364_v31 = vperm.slane %v301_v21, 1  ;;  %v365_v32 = vperm.slane %v301_v21, 2  ;;  %543 = vst [vmem:[%s1114_s20 + $0x38] sm:$0xff] %v511_v23 }
  0x56   : > { %v448_v33 = vsel %vm439_vm3, %v359_v16, %v415_v25  ;;  %v366_v34 = vperm.slane %v301_v21, 3  ;;  %v310_v39 = vsel %vm309_vm10, %v308_v36, %v307_v27  ;;  %v367_v44 = vperm.slane %v306_v35, 0  ;;  %v228_v36 = vld [vmem:[%s1039_s14 + $0x88] sm:$0xff] }
  0x57   : > { %v512_v37 = vadd.f32 %v448_v33, %v219_v24  ;;  %v449_v0 = vsel %vm439_vm3, %v361_v18, %v416_v29  ;;  %v417_v38 = vrot.slane %v364_v31, 4  ;;  %v368_v45 = vperm.slane %v306_v35, 1  ;;  %v227_v31 = vld [vmem:[%s1039_s14 + $0x80] sm:$0xff] }
  0x58   : > { %v513_v41 = vadd.f32 %v449_v0, %v220_v28  ;;  %v418_v43 = vrot.slane %v366_v34, 4  ;;  %v369_v6 = vperm.slane %v306_v35, 2  ;;  %v370_v46 = vperm.slane %v306_v35, 3 }
  0x59   : > { %544 = vst [vmem:[%s1114_s20 + $0x40] sm:$0xff] %v512_v37  ;;  %v450_v5 = vsel %vm439_vm3, %v363_v30, %v417_v38  ;;  %v311_v47 = vrot.slane %v310_v39, 7  ;;  %v419_v52 = vrot.slane %v368_v45, 4  ;;  %v1177_v1 = vrot.slane %v249_v48, 6  ;;  %v229_v45 = vld [vmem:[%s1039_s14 + $0x90] sm:$0xff] }
  0x5a   : > { %545 = vst [vmem:[%s1114_s20 + $0x48] sm:$0xff] %v513_v41  ;;  %v514_v49 = vadd.f32 %v450_v5, %v221_v4  ;;  %v451_v50 = vsel %vm439_vm3, %v365_v32, %v418_v43  ;;  %v420_v57 = vrot.slane %v370_v46, 4  ;;  %v1182_v9 = vrot.slane %v250_v53, 5 }
  0x5b   : > { %v515_v55 = vadd.f32 %v451_v50, %v222_v42  ;;  %v371_v58 = vperm.slane %v311_v47, 0  ;;  %v372_v59 = vperm.slane %v311_v47, 1  ;;  %v452_v61 = vsel %vm439_vm3, %v367_v44, %v419_v52 }
  0x5c   : > { %546 = vst [vmem:[%s1114_s20 + $0x50] sm:$0xff] %v514_v49  ;;  %v373_v62 = vperm.slane %v311_v47, 2  ;;  %v374_v63 = vperm.slane %v311_v47, 3  ;;  %v516_v2 = vadd.f32 %v452_v61, %v223_v51  ;;  %v453_v3 = vsel %vm439_vm3, %v369_v6, %v420_v57  ;;  %v230_v47 = vld [vmem:[%s1039_s14 + $0x98] sm:$0xff] }
  0x5d   : > { %547 = vst [vmem:[%s1114_s20 + $0x58] sm:$0xff] %v515_v55  ;;  %v421_v8 = vrot.slane %v372_v59, 4  ;;  %v517_v10 = vadd.f32 %v453_v3, %v224_v56  ;;  %v312_v13 = vsel %vm265_vm0, %v1173_v60, %v1169_v54  ;;  %v315_v14 = vsel %vm271_vm4, %v1173_v60, %v1169_v54 }
  0x5e   : > { %v422_v12 = vrot.slane %v374_v63, 4  ;;  %548 = vst [vmem:[%s1114_s20 + $0x60] sm:$0xff] %v516_v2  ;;  %v313_v16 = vsel %vm267_vm1, %v1177_v1, %v1182_v9  ;;  %v316_v17 = vsel %vm273_vm5, %v1177_v1, %v1182_v9  ;;  %v319_v18 = vsel %vm267_vm1, %v1173_v60, %v1169_v54  ;;  %v232_v63 = vld [vmem:[%s1039_s14 + $0xa8] sm:$0xff] }
  0x5f   : > { %v454_v15 = vsel %vm439_vm3, %v371_v58, %v421_v8  ;;  %549 = vst [vmem:[%s1114_s20 + $0x68] sm:$0xff] %v517_v10  ;;  %v314_v21 = vsel %vm269_vm2, %v312_v13, %v313_v16  ;;  %v317_v22 = vsel %vm275_vm6, %v315_v14, %v316_v17  ;;  %v320_v29 = vsel %vm279_vm7, %v1177_v1, %v1182_v9  ;;  %v231_v58 = vld [vmem:[%s1039_s14 + $0xa0] sm:$0xff]  ;;  %v233_v10 = vld [vmem:[%s1039_s14 + $0xb0] sm:$0xff]  ;;  %v234_v16 = vld [vmem:[%s1039_s14 + $0xb8] sm:$0xff] }
  0x60   : > { %v518_v19 = vadd.f32 %v454_v15, %v225_v7  ;;  %v455_v20 = vsel %vm439_vm3, %v373_v62, %v422_v12  ;;  %v375_v24 = vperm.slane %v314_v21, 0  ;;  %v376_v25 = vperm.slane %v314_v21, 1 }
  0x61   : > { %v519_v23 = vadd.f32 %v455_v20, %v226_v11  ;;  %v377_v26 = vperm.slane %v314_v21, 2  ;;  %v378_v27 = vperm.slane %v314_v21, 3  ;;  %v318_v28 = vrot.slane %v317_v22, 1 }
  0x62   : > { %550 = vst [vmem:[%s1114_s20 + $0x70] sm:$0xff] %v518_v19  ;;  %v323_v30 = vsel %vm273_vm5, %v1173_v60, %v1169_v54  ;;  %v423_v32 = vrot.slane %v376_v25, 4  ;;  %v321_v33 = vsel %vm281_vm8, %v319_v18, %v320_v29  ;;  %v324_v34 = vsel %vm285_vm9, %v1177_v1, %v1182_v9 }
  0x63   : > { %551 = vst [vmem:[%s1114_s20 + $0x78] sm:$0xff] %v519_v23  ;;  %v327_v35 = vsel %vm279_vm7, %v1173_v60, %v1169_v54  ;;  %v424_v37 = vrot.slane %v378_v27, 4  ;;  %v379_v0 = vperm.slane %v318_v28, 0  ;;  %v380_v4 = vperm.slane %v318_v28, 1 }
  0x64   : > { %v381_v38 = vperm.slane %v318_v28, 2  ;;  %v456_v39 = vsel %vm439_vm3, %v375_v24, %v423_v32  ;;  %v382_v40 = vperm.slane %v318_v28, 3  ;;  %v322_v41 = vrot.slane %v321_v33, 2 }
  0x65   : > { %vm1341_vm1 = vcmask 1044483   ;;  %v520_v43 = vadd.f32 %v456_v39, %v227_v31  ;;  %v457_v44 = vsel %vm439_vm3, %v377_v26, %v424_v37  ;;  %v425_v5 = vrot.slane %v380_v4, 4  ;;  %v236_v4 = vld [vmem:[%s1039_s14 + $0xc8] sm:$0xff] }
  0x66   : > { %v325_v42 = vsel %vm1341_vm1, %v323_v30, %v324_v34  ;;  %v521_v46 = vadd.f32 %v457_v44, %v228_v36  ;;  %v426_v48 = vrot.slane %v382_v40, 4  ;;  %v383_v49 = vperm.slane %v322_v41, 0 }
  0x67   : > { %v326_v6 = vrot.slane %v325_v42, 3  ;;  %v384_v50 = vperm.slane %v322_v41, 1  ;;  %552 = vst [vmem:[%s1114_s20 + $0x80] sm:$0xff] %v520_v43  ;;  %v458_v51 = vsel %vm439_vm3, %v379_v0, %v425_v5  ;;  %v385_v52 = vperm.slane %v322_v41, 2  ;;  %v237_v5 = vld [vmem:[%s1039_s14 + $0xd0] sm:$0xff] }
  0x68   : > { %v386_v53 = vperm.slane %v322_v41, 3  ;;  %553 = vst [vmem:[%s1114_s20 + $0x88] sm:$0xff] %v521_v46  ;;  %v522_v56 = vadd.f32 %v458_v51, %v229_v45  ;;  %v459_v57 = vsel %vm439_vm3, %v381_v38, %v426_v48  ;;  %v328_v12 = vsel %vm291_vm11, %v1177_v1, %v1182_v9  ;;  %v238_v46 = vld [vmem:[%s1039_s14 + $0xd8] sm:$0xff] }
  0x69   : > { %v387_v55 = vperm.slane %v326_v6, 0  ;;  %v427_v59 = vrot.slane %v384_v50, 4  ;;  %v388_v61 = vperm.slane %v326_v6, 1  ;;  %v523_v62 = vadd.f32 %v459_v57, %v230_v47  ;;  %v239_v57 = vld [vmem:[%s1039_s14 + $0xe0] sm:$0xff] }
  0x6a   : > { %v428_v2 = vrot.slane %v386_v53, 4  ;;  %v389_v3 = vperm.slane %v326_v6, 2  ;;  %v390_v7 = vperm.slane %v326_v6, 3  ;;  %554 = vst [vmem:[%s1114_s20 + $0x90] sm:$0xff] %v522_v56  ;;  %v331_v13 = vsel %vm285_vm9, %v1173_v60, %v1169_v54 }
  0x6b   : > { %v460_v8 = vsel %vm439_vm3, %v383_v49, %v427_v59  ;;  %v429_v11 = vrot.slane %v388_v61, 4  ;;  %555 = vst [vmem:[%s1114_s20 + $0x98] sm:$0xff] %v523_v62  ;;  %v329_v18 = vsel %vm293_vm12, %v327_v35, %v328_v12  ;;  %v332_v22 = vsel %vm297_vm13, %v1182_v9, %v1177_v1  ;;  %v235_v35 = vld [vmem:[%s1039_s14 + $0xc0] sm:$0xff]  ;;  %v240_v62 = vld [vmem:[%s1039_s14 + $0xe8] sm:$0xff] }
  0x6c   : > { %v524_v14 = vadd.f32 %v460_v8, %v231_v58  ;;  %v461_v15 = vsel %vm439_vm3, %v385_v52, %v428_v2  ;;  %v430_v17 = vrot.slane %v390_v7, 4  ;;  %v330_v21 = vrot.slane %v329_v18, 4  ;;  %v241_v8 = vld [vmem:[%s1039_s14 + $0xf0] sm:$0xff] }
  0x6d   : > { %v525_v19 = vadd.f32 %v461_v15, %v232_v63  ;;  %v462_v20 = vsel %vm439_vm3, %v387_v55, %v429_v11  ;;  %v333_v25 = vsel %vm299_vm14, %v331_v13, %v332_v22  ;;  %v335_v26 = vsel %vm291_vm11, %v1173_v60, %v1169_v54  ;;  %v242_v13 = vld [vmem:[%s1039_s14 + $0xf8] sm:$0xff] }
  0x6e   : > { %556 = vst [vmem:[%s1114_s20 + $0xa0] sm:$0xff] %v524_v14  ;;  %v526_v23 = vadd.f32 %v462_v20, %v233_v10  ;;  %v463_v24 = vsel %vm439_vm3, %v389_v3, %v430_v17  ;;  %v391_v28 = vperm.slane %v330_v21, 0  ;;  %v392_v29 = vperm.slane %v330_v21, 1 }
  0x6f   : > { %557 = vst [vmem:[%s1114_s20 + $0xa8] sm:$0xff] %v525_v19  ;;  %v527_v27 = vadd.f32 %v463_v24, %v234_v16  ;;  %v393_v30 = vperm.slane %v330_v21, 2  ;;  %v394_v31 = vperm.slane %v330_v21, 3  ;;  %v334_v32 = vrot.slane %v333_v25, 5 }
  0x70   : > { %558 = vst [vmem:[%s1114_s20 + $0xb0] sm:$0xff] %v526_v23  ;;  %v336_v33 = vsel %vm265_vm0, %v1177_v1, %v1182_v9  ;;  %v339_v34 = vsel %vm297_vm13, %v1169_v54, %v1173_v60  ;;  %v431_v36 = vrot.slane %v392_v29, 4  ;;  %v340_v0 = vsel %vm271_vm4, %v1177_v1, %v1182_v9 }
  0x71   : > { %559 = vst [vmem:[%s1114_s20 + $0xb8] sm:$0xff] %v527_v27  ;;  %v337_v37 = vsel %vm304_vm15, %v336_v33, %v335_v26  ;;  %v432_v38 = vrot.slane %v394_v31, 4  ;;  %v395_v39 = vperm.slane %v334_v32, 0  ;;  %v396_v40 = vperm.slane %v334_v32, 1 }
  0x72   : > { %v397_v41 = vperm.slane %v334_v32, 2  ;;  %v464_v42 = vsel %vm439_vm3, %v391_v28, %v431_v36  ;;  %v398_v54 = vperm.slane %v334_v32, 3  ;;  %v338_v60 = vrot.slane %v337_v37, 6 }
  0x73   : > { %v341_v43 = vsel %vm309_vm10, %v340_v0, %v339_v34  ;;  %v528_v44 = vadd.f32 %v464_v42, %v235_v35  ;;  %v465_v45 = vsel %vm439_vm3, %v393_v30, %v432_v38  ;;  %v433_v1 = vrot.slane %v396_v40, 4 }
  0x74   : > { %v342_v9 = vrot.slane %v341_v43, 7  ;;  %v529_v6 = vadd.f32 %v465_v45, %v236_v4  ;;  %v434_v47 = vrot.slane %v398_v54, 4  ;;  %v399_v48 = vperm.slane %v338_v60, 0 }
  0x75   : > { %v400_v49 = vperm.slane %v338_v60, 1  ;;  %560 = vst [vmem:[%s1114_s20 + $0xc0] sm:$0xff] %v528_v44  ;;  %v466_v50 = vsel %vm439_vm3, %v395_v39, %v433_v1  ;;  %v401_v51 = vperm.slane %v338_v60, 2  ;;  %v402_v52 = vperm.slane %v338_v60, 3 }
  0x76   : > { %v403_v53 = vperm.slane %v342_v9, 0  ;;  %561 = vst [vmem:[%s1114_s20 + $0xc8] sm:$0xff] %v529_v6  ;;  %v530_v55 = vadd.f32 %v466_v50, %v237_v5  ;;  %v467_v56 = vsel %vm439_vm3, %v397_v41, %v434_v47  ;;  %v404_v59 = vperm.slane %v342_v9, 1 }
  0x77   : > { %v435_v58 = vrot.slane %v400_v49, 4  ;;  %v531_v61 = vadd.f32 %v467_v56, %v238_v46  ;;  %v436_v63 = vrot.slane %v402_v52, 4  ;;  %v405_v2 = vperm.slane %v342_v9, 2 }
  0x78   : > { %v406_v3 = vperm.slane %v342_v9, 3  ;;  %562 = vst [vmem:[%s1114_s20 + $0xd0] sm:$0xff] %v530_v55  ;;  %v437_v10 = vrot.slane %v404_v59, 4 }
  0x79   : > { %v468_v7 = vsel %vm439_vm3, %v399_v48, %v435_v58  ;;  %563 = vst [vmem:[%s1114_s20 + $0xd8] sm:$0xff] %v531_v61  ;;  %v469_v12 = vsel %vm439_vm3, %v401_v51, %v436_v63 }
  0x7a   : > { %v532_v11 = vadd.f32 %v468_v7, %v239_v57  ;;  %v438_v14 = vrot.slane %v406_v3, 4  ;;  %v533_v15 = vadd.f32 %v469_v12, %v240_v62  ;;  %v470_v16 = vsel %vm439_vm3, %v403_v53, %v437_v10 }
  0x7b   : > { %v534_v17 = vadd.f32 %v470_v16, %v241_v8 }
  0x7c   : > { %564 = vst [vmem:[%s1114_s20 + $0xe0] sm:$0xff] %v532_v11  ;;  %v471_v18 = vsel %vm439_vm3, %v405_v2, %v438_v14 }
  0x7d   : > { %565 = vst [vmem:[%s1114_s20 + $0xe8] sm:$0xff] %v533_v15  ;;  %v535_v19 = vadd.f32 %v471_v18, %v242_v13 }
  0x7e   : > { %566 = vst [vmem:[%s1114_s20 + $0xf0] sm:$0xff] %v534_v17 }
  0x7f   : > { %567 = vst [vmem:[%s1114_s20 + $0xf8] sm:$0xff] %v535_v19 }
  0x80   : > { %852 = shalt.err (!%p849_p13)
}
  0x81   : > { %s901_s30 = smov 256   ;;  %s902_s14 = smov 16  }
  0x82   : > { %712 = dma.vmem_to_hbm [thread:$0]  (%p967_p10), %s583_s29, 4096, %s585_s3, %s569_s5, %s901_s30, %s901_s30, %s902_s14  }
  0x83 PF: > { %p726_p0 = scmp.ge.s32.totalorder %s895_s12, 2  ;;  %s599_s4 = sand.u32 1, %s883_s9  }
  0x84   : > { %s600_s26 = scalar_lea.sflag [#allocation4], %s599_s4 }
  0x85   : > { %p722_p4 = pnand %p726_p0, %p971_p11 }
  0x87   : > { %p723_p5 = pneg %p722_p4 }
  0x89   : > { %878 = dma.done.wait (%p723_p5), %s600_s26, 4096  }
  0x8a   : > { %880 = vsyncadd (%p723_p5), %s600_s26, 4294963200  ;;  %p18_p7 = scmp.ge.s32.totalorder %s943_s15, 6   ;;  %s1342_s9 = smov %s887_s10 }
  0x8b   : > { %s1343_s10 = smov %s891_s11  ;;  %s1344_s11 = smov %s955_s18 }
  0x8c   : > { %s1345_s12 = smov %s943_s15  ;;  %20 = sbr.rel (!%p18_p7) target bundleno = 7 (0x7), region = 86 }
  0x91   :  { %606 = vsyncpa [#allocation3], 1 }
  0x92   :  { %608 = vsyncpa [#allocation3 + $0x1], 1 }
  0x93   :  { %609 = vsyncpa [#allocation6], 1 }
  0x94   :  { %611 = vsyncpa [#allocation6 + $0x1], 1 }
  0x95   :  { %612 = vsyncpa [#allocation4], 1 }
  0x96   :  { %614 = vsyncpa [#allocation4 + $0x1], 1 }

</bundles_post_ra>
